<compile_context>
chip_gen: v5e
topology: v5e:2x2
jax: 0.10.0
libtpu: 0.0.40
codegen_flags: <defaults>
</compile_context>

<pallas_src>
import jax
import jax.numpy as jnp
from jax.experimental import pallas as pl
from jax.experimental.pallas import tpu as pltpu


def _device_kind():
    try:
        return jax.devices()[0].device_kind.lower()
    except Exception:
        return ""


def _vmem_limit_bytes():
    mib = 1024 * 1024
    kind = _device_kind()
    is_v7 = "v7" in kind
    cap = (64 if is_v7 else 128) * mib
    try:
        cap = int(pltpu.get_tpu_info().vmem_capacity_bytes)
    except Exception:
        pass
    limit = min(cap // 2, (32 if is_v7 else 64) * mib)
    return max(limit, 16 * mib)


def _tensorcores_per_chip():
    # Only v7x exposes two TensorCores per chip among v5e/v6e/v7x.
    return 2 if "v7" in _device_kind() else 1


def _make_kernel(tile_t, acc_w, n_chunks, nt_per_shard, l_mel, l_gate,
                 mask_gate, n_shards):
    def kernel(om_ref, am_ref, gz_ref, gx_ref, out_ref, acc_ref):
        s = pl.program_id(0)          # shard ("parallel") axis
        t = pl.program_id(1)          # time-tile ("arbitrary" reduction) axis

        @pl.when(t == 0)
        def _init():
            acc_ref[...] = jnp.zeros_like(acc_ref)

        # ---- mel squared-error partial sums (elementwise, VPU) ----
        d = am_ref[...].astype(jnp.float32) - om_ref[...].astype(jnp.float32)
        sq = d * d
        start = (s * nt_per_shard + t) * tile_t   # element offset of this tile

        def accumulate(vals):
            for c in range(n_chunks):             # static, lane-aligned slices
                acc_ref[...] += vals[:, c * acc_w:(c + 1) * acc_w]

        @pl.when(start + tile_t <= l_mel)         # interior tile: no masking
        def _interior():
            accumulate(sq)

        @pl.when(start + tile_t > l_mel)          # boundary / phantom tile
        def _boundary():
            col = start + jax.lax.broadcasted_iota(jnp.int32, sq.shape, 1)
            accumulate(jnp.where(col < l_mel, sq, 0.0))

        # ---- finalize: single cross-lane reduction + gate BCE (shard 0) ----
        @pl.when(t == nt_per_shard - 1)
        def _finalize():
            mel_sum = jnp.sum(acc_ref[...])

            def write_out(gate_sum):
                sub = jax.lax.broadcasted_iota(jnp.int32, out_ref.shape, 1)
                lane = jax.lax.broadcasted_iota(jnp.int32, out_ref.shape, 2)
                out_ref[...] = jnp.where(
                    (sub == 0) & (lane == 0), mel_sum,
                    jnp.where((sub == 0) & (lane == 1), gate_sum, 0.0))

            def gate_bce_sum():
                z = gz_ref[...]       # targets, lane-dense (rows, 128), f32
                x = gx_ref[...]       # logits
                # stable BCE-with-logits: max(x,0) - x*z + log1p(exp(-|x|))
                bce = (jnp.maximum(x, 0.0) - x * z
                       + jnp.log1p(jnp.exp(-jnp.abs(x))))
                if mask_gate:
                    r = jax.lax.broadcasted_iota(jnp.int32, bce.shape, 0)
                    c = jax.lax.broadcasted_iota(jnp.int32, bce.shape, 1)
                    bce = jnp.where(r * 128 + c < l_gate, bce, 0.0)
                return jnp.sum(bce)

            if n_shards == 1:
                write_out(gate_bce_sum())
            else:
                @pl.when(s == 0)
                def _shard0():
                    write_out(gate_bce_sum())

                @pl.when(s != 0)
                def _other_shards():
                    write_out(jnp.float32(0.0))

    return kernel


def tacotron2_loss(ori_mel, ori_gate, adv_mel, adv_gate, *,
                   target_tile_t=2048, force_shards=None):
    """JAX/Pallas equivalent of Tacotron2Loss.forward.

    ori_mel, adv_mel : (B, n_mels, T) float (f32 or bf16)
    ori_gate         : any shape, flattened (BCE targets)
    adv_gate         : any shape, flattened (BCE logits)
    returns float32 scalar.
    """
    assert ori_mel.shape == adv_mel.shape and ori_mel.ndim == 3
    B, n_mels, T = ori_mel.shape
    R = B * n_mels

    og_flat = ori_gate.reshape(-1)
    ag_flat = adv_gate.reshape(-1)
    L = min(og_flat.shape[0], ag_flat.shape[0])     # static at trace time
    L_mel = min(L, T)

    # ---- lane-dense gate layout: (rows, 128), zero-padded, masked in-kernel ----
    gr8 = ((pl.cdiv(L, 128) + 7) // 8) * 8
    l_pad = gr8 * 128
    z_gate = jnp.pad(og_flat[:L].astype(jnp.float32), (0, l_pad - L)).reshape(gr8, 128)
    x_gate = jnp.pad(ag_flat[:L].astype(jnp.float32), (0, l_pad - L)).reshape(gr8, 128)
    mask_gate = (l_pad != L)

    # ---- flatten mels to 2D so tile bytes don't depend on tiny leading dims ----
    om2 = ori_mel.reshape(R, T)
    am2 = adv_mel.reshape(R, T)
    itemsize = max(ori_mel.dtype.itemsize, adv_mel.dtype.itemsize)

    # ---- generation-aware VMEM budget (v7x: 64 MiB/TC; v5e/v6e: 128 MiB) ----
    vmem_limit = _vmem_limit_bytes()
    fixed_bytes = (R * 128 * 4                      # (R,128) f32 accumulator
                   + 2 * 2 * gr8 * 128 * 4          # two gate arrays x 2 buffers
                   + 2 * 8 * 128 * 4)               # out block x 2 buffers
    budget = vmem_limit - fixed_bytes - 2 * 1024 * 1024   # headroom for internals

    target_tile_t = max(128, (target_tile_t // 128) * 128)

    def mel_bytes(t):                               # 2 inputs x 2 pipeline buffers
        return 4 * R * t * itemsize

    if T < 128 or (T <= target_tile_t and mel_bytes(T) <= budget):
        tile_t = T                                  # single full-extent tile
    else:
        tile_t = min(target_tile_t, max(128, (T // 128) * 128))
        while tile_t > 128 and mel_bytes(tile_t) > budget:
            tile_t -= 128

    if tile_t % 128 == 0:
        acc_w, n_chunks = 128, tile_t // 128
    else:
        acc_w, n_chunks = tile_t, 1                 # only when tile_t == T < 128-ish

    nt_total = pl.cdiv(L_mel, tile_t)
    n_shards = int(force_shards) if force_shards is not None else _tensorcores_per_chip()
    n_shards = max(1, n_shards)
    if nt_total < 2:
        n_shards = 1
    nt_per_shard = pl.cdiv(nt_total, n_shards)
    max_blk = pl.cdiv(T, tile_t) - 1
    need_clamp = (n_shards * nt_per_shard - 1) > max_blk   # phantom tiles exist

    def mel_index_map(s, t):
        g = s * nt_per_shard + t
        if need_clamp:
            g = jnp.minimum(g, max_blk)             # phantom tiles are fully masked
        return (0, g)

    kernel = _make_kernel(tile_t, acc_w, n_chunks, nt_per_shard,
                          L_mel, L, mask_gate, n_shards)

    out = pl.pallas_call(
        kernel,
        out_shape=jax.ShapeDtypeStruct((n_shards, 8, 128), jnp.float32),
        grid=(n_shards, nt_per_shard),
        in_specs=[
            pl.BlockSpec((R, tile_t), mel_index_map),
            pl.BlockSpec((R, tile_t), mel_index_map),
            pl.BlockSpec((gr8, 128), lambda s, t: (0, 0)),
            pl.BlockSpec((gr8, 128), lambda s, t: (0, 0)),
        ],
        out_specs=pl.BlockSpec((1, 8, 128), lambda s, t: (s, 0, 0)),
        scratch_shapes=[pltpu.VMEM((R, acc_w), jnp.float32)],
        compiler_params=pltpu.CompilerParams(
            dimension_semantics=("parallel", "arbitrary"),
            vmem_limit_bytes=vmem_limit),
    )(om2, am2, z_gate, x_gate)

    mel_sum = jnp.sum(out[:, 0, 0])                 # combine per-shard partials
    gate_sum = out[0, 0, 1]                         # written by shard 0 only
    mel_loss = mel_sum / jnp.float32(R * L_mel)
    gate_loss = gate_sum / jnp.float32(L)
    return -mel_loss + gate_loss


def _reference(ori_mel, ori_gate, adv_mel, adv_gate):
    og = ori_gate.reshape(-1)
    ag = adv_gate.reshape(-1)
    L = min(og.shape[0], ag.shape[0])
    mel_loss = jnp.mean((adv_mel[:, :, :L].astype(jnp.float32)
                         - ori_mel[:, :, :L].astype(jnp.float32)) ** 2)
    x = ag[:L].astype(jnp.float32)
    z = og[:L].astype(jnp.float32)
    gate_loss = jnp.mean(jnp.maximum(x, 0.0) - x * z
                         + jnp.log1p(jnp.exp(-jnp.abs(x))))
    return -mel_loss + gate_loss


if __name__ == "__main__":
    key = jax.random.PRNGKey(0)
    ks = jax.random.split(key, 12)

    # --- case 1: small, single full tile, single shard ---
    B, M, T = 2, 8, 20
    om = jax.random.normal(ks[0], (B, M, T), dtype=jnp.float32)
    am = jax.random.normal(ks[1], (B, M, T), dtype=jnp.float32)
    og = jax.random.uniform(ks[2], (B, 8), dtype=jnp.float32)     # 16 targets
    ag = jax.random.normal(ks[3], (B, 10), dtype=jnp.float32)     # 20 logits
    loss = jax.block_until_ready(tacotron2_loss(om, og, am, ag))
    ref = _reference(om, og, am, ag)
    assert jnp.allclose(loss, ref, atol=1e-5, rtol=1e-5), (loss, ref)

    # --- case 2: multi-tile, masked boundary tile, 2-shard code path (forced) ---
    B, M, T = 2, 8, 2048
    om = jax.random.normal(ks[4], (B, M, T), dtype=jnp.float32)
    am = jax.random.normal(ks[5], (B, M, T), dtype=jnp.float32)
    og = jax.random.uniform(ks[6], (B, 1000), dtype=jnp.float32)  # 2000 targets
    ag = jax.random.normal(ks[7], (B, 1024), dtype=jnp.float32)   # 2048 logits
    loss = jax.block_until_ready(
        tacotron2_loss(om, og, am, ag, target_tile_t=512, force_shards=2))
    ref = _reference(om, og, am, ag)
    assert jnp.allclose(loss, ref, atol=1e-3, rtol=1e-3), (loss, ref)

    # --- case 3: bf16 mels, gate length > T, phantom-tile clamp path ---
    B, M, T = 2, 8, 1280
    om = jax.random.normal(ks[8], (B, M, T), dtype=jnp.float32).astype(jnp.bfloat16)
    am = jax.random.normal(ks[9], (B, M, T), dtype=jnp.float32).astype(jnp.bfloat16)
    og = jax.random.uniform(ks[10], (B, 650), dtype=jnp.float32)  # 1300 targets
    ag = jax.random.normal(ks[11], (B, 700), dtype=jnp.float32)   # 1400 logits
    loss = jax.block_until_ready(
        tacotron2_loss(om, og, am, ag, target_tile_t=512, force_shards=2))
    ref = _reference(om, og, am, ag)
    assert jnp.allclose(loss, ref, atol=2e-3, rtol=2e-3), (loss, ref)

    print("KERNEL_OK")
</pallas_src>

<mosaic_0001>
module attributes {stable_mosaic.version = 11 : i64} {
  func.func @kernel(%arg0: i32, %arg1: i32, %arg2: memref<16x20xf32, #tpu.memory_space<vmem>>, %arg3: memref<16x20xf32, #tpu.memory_space<vmem>>, %arg4: memref<8x128xf32, #tpu.memory_space<vmem>>, %arg5: memref<8x128xf32, #tpu.memory_space<vmem>>, %arg6: memref<1x8x128xf32, #tpu.memory_space<vmem>>, %arg7: memref<16x20xf32, #tpu.memory_space<vmem>>) attributes {dimension_semantics = [#tpu.dimension_semantics<parallel>, #tpu.dimension_semantics<arbitrary>], iteration_bounds = array<i64: 1, 1>, scalar_prefetch = 0 : i64, scratch_operands = 1 : i64, tpu.core_type = #tpu.core_type<tc>, window_params = [{transform_indices = @transform_0, window_bounds = array<i64: 16, 20>}, {transform_indices = @transform_1, window_bounds = array<i64: 16, 20>}, {pipeline_mode = #tpu.pipeline_mode<synchronous>, transform_indices = @transform_2, window_bounds = array<i64: 8, 128>}, {pipeline_mode = #tpu.pipeline_mode<synchronous>, transform_indices = @transform_3, window_bounds = array<i64: 8, 128>}, {transform_indices = @transform_4, window_bounds = array<i64: 1, 8, 128>}]} {
    %c0_i32 = arith.constant 0 : i32
    %0 = arith.cmpi eq, %arg1, %c0_i32 : i32
    %1 = arith.extui %0 : i1 to i32
    %c0_i32_0 = arith.constant 0 : i32
    %2 = arith.cmpi ne, %1, %c0_i32_0 : i32
    scf.if %2 {
      %cst = arith.constant 0.000000e+00 : f32
      %21 = vector.broadcast %cst : f32 to vector<16x20xf32>
      %c0_11 = arith.constant 0 : index
      %c0_12 = arith.constant 0 : index
      %22 = vector.load %arg7[%c0_11, %c0_12] : memref<16x20xf32, #tpu.memory_space<vmem>>, vector<16x20xf32>
      tpu.vector_store %arg7[%c0_11, %c0_12], %21 {strides = array<i32>} : memref<16x20xf32, #tpu.memory_space<vmem>>, vector<16x20xf32>,
    } else {
    }
    %c0 = arith.constant 0 : index
    %c0_1 = arith.constant 0 : index
    %3 = vector.load %arg3[%c0, %c0_1] : memref<16x20xf32, #tpu.memory_space<vmem>>, vector<16x20xf32>
    %c0_2 = arith.constant 0 : index
    %c0_3 = arith.constant 0 : index
    %4 = vector.load %arg2[%c0_2, %c0_3] : memref<16x20xf32, #tpu.memory_space<vmem>>, vector<16x20xf32>
    %5 = arith.subf %3, %4 : vector<16x20xf32>
    %6 = arith.mulf %5, %5 : vector<16x20xf32>
    %c1_i32 = arith.constant 1 : i32
    %7 = arith.muli %arg0, %c1_i32 : i32
    %8 = arith.addi %7, %arg1 : i32
    %c20_i32 = arith.constant 20 : i32
    %9 = arith.muli %8, %c20_i32 : i32
    %c20_i32_4 = arith.constant 20 : i32
    %10 = arith.addi %9, %c20_i32_4 : i32
    %c16_i32 = arith.constant 16 : i32
    %11 = arith.cmpi sle, %10, %c16_i32 : i32
    %12 = arith.extui %11 : i1 to i32
    %c0_i32_5 = arith.constant 0 : i32
    %13 = arith.cmpi ne, %12, %c0_i32_5 : i32
    scf.if %13 {
      %c0_11 = arith.constant 0 : index
      %c0_12 = arith.constant 0 : index
      %21 = vector.load %arg7[%c0_11, %c0_12] : memref<16x20xf32, #tpu.memory_space<vmem>>, vector<16x20xf32>
      %22 = arith.addf %21, %6 : vector<16x20xf32>
      %c0_13 = arith.constant 0 : index
      %c0_14 = arith.constant 0 : index
      %23 = vector.load %arg7[%c0_13, %c0_14] : memref<16x20xf32, #tpu.memory_space<vmem>>, vector<16x20xf32>
      tpu.vector_store %arg7[%c0_13, %c0_14], %22 {strides = array<i32>} : memref<16x20xf32, #tpu.memory_space<vmem>>, vector<16x20xf32>,
    } else {
    }
    %c20_i32_6 = arith.constant 20 : i32
    %14 = arith.addi %9, %c20_i32_6 : i32
    %c16_i32_7 = arith.constant 16 : i32
    %15 = arith.cmpi sgt, %14, %c16_i32_7 : i32
    %16 = arith.extui %15 : i1 to i32
    %c0_i32_8 = arith.constant 0 : i32
    %17 = arith.cmpi ne, %16, %c0_i32_8 : i32
    scf.if %17 {
      %21 = tpu.iota {dimensions = array<i32: 1>} : vector<16x20xi32>
      %22 = vector.broadcast %9 : i32 to vector<16x20xi32>
      %23 = arith.addi %22, %21 : vector<16x20xi32>
      %c16_i32_11 = arith.constant 16 : i32
      %24 = vector.broadcast %c16_i32_11 : i32 to vector<16x20xi32>
      %25 = arith.cmpi slt, %23, %24 : vector<16x20xi32>
      %cst = arith.constant 0.000000e+00 : f32
      %26 = vector.broadcast %cst : f32 to vector<16x20xf32>
      %27 = arith.select %25, %6, %26 : vector<16x20xi1>, vector<16x20xf32>
      %c0_12 = arith.constant 0 : index
      %c0_13 = arith.constant 0 : index
      %28 = vector.load %arg7[%c0_12, %c0_13] : memref<16x20xf32, #tpu.memory_space<vmem>>, vector<16x20xf32>
      %29 = arith.addf %28, %27 : vector<16x20xf32>
      %c0_14 = arith.constant 0 : index
      %c0_15 = arith.constant 0 : index
      %30 = vector.load %arg7[%c0_14, %c0_15] : memref<16x20xf32, #tpu.memory_space<vmem>>, vector<16x20xf32>
      tpu.vector_store %arg7[%c0_14, %c0_15], %29 {strides = array<i32>} : memref<16x20xf32, #tpu.memory_space<vmem>>, vector<16x20xf32>,
    } else {
    }
    %c0_i32_9 = arith.constant 0 : i32
    %18 = arith.cmpi eq, %arg1, %c0_i32_9 : i32
    %19 = arith.extui %18 : i1 to i32
    %c0_i32_10 = arith.constant 0 : i32
    %20 = arith.cmpi ne, %19, %c0_i32_10 : i32
    scf.if %20 {
      %c0_11 = arith.constant 0 : index
      %c0_12 = arith.constant 0 : index
      %21 = vector.load %arg7[%c0_11, %c0_12] : memref<16x20xf32, #tpu.memory_space<vmem>>, vector<16x20xf32>
      %22 = vector.shape_cast %21 : vector<16x20xf32> to vector<1x16x20xf32>
      %cst = arith.constant dense<0.000000e+00> : vector<1xf32>
      %23 = vector.multi_reduction <add>, %22, %cst [1, 2] : vector<1x16x20xf32> to vector<1xf32>
      %24 = vector.shape_cast %23 : vector<1xf32> to vector<1x1x1xf32>
      %25 = vector.extract %24[0, 0, 0] : f32 from vector<1x1x1xf32>
      %c0_13 = arith.constant 0 : index
      %c0_14 = arith.constant 0 : index
      %26 = vector.load %arg4[%c0_13, %c0_14] : memref<8x128xf32, #tpu.memory_space<vmem>>, vector<8x128xf32>
      %c0_15 = arith.constant 0 : index
      %c0_16 = arith.constant 0 : index
      %27 = vector.load %arg5[%c0_15, %c0_16] : memref<8x128xf32, #tpu.memory_space<vmem>>, vector<8x128xf32>
      %cst_17 = arith.constant 0.000000e+00 : f32
      %28 = vector.broadcast %cst_17 : f32 to vector<8x128xf32>
      %29 = arith.maximumf %27, %28 : vector<8x128xf32>
      %30 = arith.mulf %27, %26 : vector<8x128xf32>
      %31 = arith.subf %29, %30 : vector<8x128xf32>
      %32 = math.absf %27 : vector<8x128xf32>
      %cst_18 = arith.constant 0.000000e+00 : f32
      %33 = vector.broadcast %cst_18 : f32 to vector<8x128xf32>
      %34 = arith.subf %33, %32 : vector<8x128xf32>
      %35 = math.exp %34 : vector<8x128xf32>
      %36 = math.log1p %35 : vector<8x128xf32>
      %37 = arith.addf %31, %36 : vector<8x128xf32>
      %38 = tpu.iota {dimensions = array<i32: 0>} : vector<8x128xi32>
      %39 = tpu.iota {dimensions = array<i32: 1>} : vector<8x128xi32>
      %c128_i32 = arith.constant 128 : i32
      %40 = vector.broadcast %c128_i32 : i32 to vector<8x128xi32>
      %41 = arith.muli %38, %40 : vector<8x128xi32>
      %42 = arith.addi %41, %39 : vector<8x128xi32>
      %c16_i32_19 = arith.constant 16 : i32
      %43 = vector.broadcast %c16_i32_19 : i32 to vector<8x128xi32>
      %44 = arith.cmpi slt, %42, %43 : vector<8x128xi32>
      %cst_20 = arith.constant 0.000000e+00 : f32
      %45 = vector.broadcast %cst_20 : f32 to vector<8x128xf32>
      %46 = arith.select %44, %37, %45 : vector<8x128xi1>, vector<8x128xf32>
      %47 = vector.shape_cast %46 : vector<8x128xf32> to vector<1x8x128xf32>
      %cst_21 = arith.constant dense<0.000000e+00> : vector<1xf32>
      %48 = vector.multi_reduction <add>, %47, %cst_21 [1, 2] : vector<1x8x128xf32> to vector<1xf32>
      %49 = vector.shape_cast %48 : vector<1xf32> to vector<1x1x1xf32>
      %50 = vector.extract %49[0, 0, 0] : f32 from vector<1x1x1xf32>
      %51 = tpu.iota {dimensions = array<i32: 1>} : vector<1x8x128xi32>
      %52 = tpu.iota {dimensions = array<i32: 2>} : vector<1x8x128xi32>
      %c0_i32_22 = arith.constant 0 : i32
      %53 = vector.broadcast %c0_i32_22 : i32 to vector<1x8x128xi32>
      %54 = arith.cmpi eq, %51, %53 : vector<1x8x128xi32>
      %c0_i32_23 = arith.constant 0 : i32
      %55 = vector.broadcast %c0_i32_23 : i32 to vector<1x8x128xi32>
      %56 = arith.cmpi eq, %52, %55 : vector<1x8x128xi32>
      %57 = arith.andi %54, %56 : vector<1x8x128xi1>
      %c0_i32_24 = arith.constant 0 : i32
      %58 = vector.broadcast %c0_i32_24 : i32 to vector<1x8x128xi32>
      %59 = arith.cmpi eq, %51, %58 : vector<1x8x128xi32>
      %c1_i32_25 = arith.constant 1 : i32
      %60 = vector.broadcast %c1_i32_25 : i32 to vector<1x8x128xi32>
      %61 = arith.cmpi eq, %52, %60 : vector<1x8x128xi32>
      %62 = arith.andi %59, %61 : vector<1x8x128xi1>
      %cst_26 = arith.constant 0.000000e+00 : f32
      %63 = vector.broadcast %50 : f32 to vector<1x8x128xf32>
      %64 = vector.broadcast %cst_26 : f32 to vector<1x8x128xf32>
      %65 = arith.select %62, %63, %64 : vector<1x8x128xi1>, vector<1x8x128xf32>
      %66 = vector.broadcast %25 : f32 to vector<1x8x128xf32>
      %67 = arith.select %57, %66, %65 : vector<1x8x128xi1>, vector<1x8x128xf32>
      %c0_27 = arith.constant 0 : index
      %c0_28 = arith.constant 0 : index
      %c0_29 = arith.constant 0 : index
      %68 = vector.load %arg6[%c0_27, %c0_28, %c0_29] : memref<1x8x128xf32, #tpu.memory_space<vmem>>, vector<1x8x128xf32>
      tpu.vector_store %arg6[%c0_27, %c0_28, %c0_29], %67 {strides = array<i32>} : memref<1x8x128xf32, #tpu.memory_space<vmem>>, vector<1x8x128xf32>,
    } else {
    }
    return
  }
  func.func @transform_0(%arg0: i32, %arg1: i32) -> (i32, i32) {
    %c1_i32 = arith.constant 1 : i32
    %0 = arith.muli %arg0, %c1_i32 : i32
    %1 = arith.addi %0, %arg1 : i32
    %c0_i32 = arith.constant 0 : i32
    %c0_i32_0 = arith.constant 0 : i32
    return %c0_i32, %1 : i32, i32
  }
  func.func @transform_1(%arg0: i32, %arg1: i32) -> (i32, i32) {
    %c1_i32 = arith.constant 1 : i32
    %0 = arith.muli %arg0, %c1_i32 : i32
    %1 = arith.addi %0, %arg1 : i32
    %c0_i32 = arith.constant 0 : i32
    %c0_i32_0 = arith.constant 0 : i32
    return %c0_i32, %1 : i32, i32
  }
  func.func @transform_2(%arg0: i32, %arg1: i32) -> (i32, i32) {
    %c0_i32 = arith.constant 0 : i32
    %c0_i32_0 = arith.constant 0 : i32
    %c0_i32_1 = arith.constant 0 : i32
    return %c0_i32, %c0_i32_0 : i32, i32
  }
  func.func @transform_3(%arg0: i32, %arg1: i32) -> (i32, i32) {
    %c0_i32 = arith.constant 0 : i32
    %c0_i32_0 = arith.constant 0 : i32
    %c0_i32_1 = arith.constant 0 : i32
    return %c0_i32, %c0_i32_0 : i32, i32
  }
  func.func @transform_4(%arg0: i32, %arg1: i32) -> (i32, i32, i32) {
    %c0_i32 = arith.constant 0 : i32
    %c0_i32_0 = arith.constant 0 : i32
    %c0_i32_1 = arith.constant 0 : i32
    return %arg0, %c0_i32, %c0_i32_0 : i32, i32, i32
  }
}

</mosaic_0001>

<bundles_post_ra>
// kernel: tpu_custom_call.1
= control target key start
LH: loop header
LB: loop body
LE: loop exit
PB: predicated region body
PF: predicated region fallthrough
CT: control target
= control target key end

     0   :  { %9 = vsyncpa [#allocation4], 0  ;;  %s419_s0 = inlined_call_operand.hbm [shape: f32[16,20], index: 0, kind: input, shape index: {}]   ;;  %s420_s1 = inlined_call_operand.hbm [shape: f32[16,20], index: 1, kind: input, shape index: {}]   ;;  %s421_s2 = inlined_call_operand.hbm [shape: f32[8,128], index: 2, kind: input, shape index: {}]   ;;  %s422_s3 = inlined_call_operand.hbm [shape: f32[8,128], index: 3, kind: input, shape index: {}]   ;;  %s423_s4 = inlined_call_operand.hbm [shape: f32[1,8,128], index: 4, kind: output, shape index: {}]  }
   0x1   :  { %10 = vsyncpa [#allocation7], 0 }
   0x2   :  { %11 = vsyncpa [#allocation10], 0 }
   0x3   :  { %12 = vsyncpa [#allocation5], 0  ;;  %s36_s17 = sshll.u32 %s420_s1, 4  ;;  %s359_s18 = smov [#allocation6]   ;;  %s37_s17 = int_to_ptr.hbm [resolvable:$true] %s36_s17 }
   0x4   :  { %s38_s19 = sshll.u32 %s359_s18, 4  ;;  %s20_s22 = sshll.u32 %s419_s0, 4  ;;  %s39_s19 = int_to_ptr.vmem [resolvable:$true] %s38_s19  ;;  %s21_s22 = int_to_ptr.hbm [resolvable:$true] %s20_s22 }
   0x5   :  { %s360_s23 = smov 128   ;;  %s361_s24 = smov 8  }
   0x6   :  { %44 = dma.hbm_to_vmem [thread:$0]  %s37_s17, 256, %s39_s19, [#allocation7], %s360_s23, %s360_s23, %s361_s24  }
   0x7   :  { %s362_s25 = smov [#allocation3]   ;;  %s50_s29 = sshll.u32 %s421_s2, 4  ;;  %s51_s29 = int_to_ptr.hbm [resolvable:$true] %s50_s29 }
   0x8   :  { %s22_s26 = sshll.u32 %s362_s25, 4  ;;  %s61_s5 = sshll.u32 %s422_s3, 4  ;;  %s23_s26 = int_to_ptr.vmem [resolvable:$true] %s22_s26  ;;  %s62_s5 = int_to_ptr.hbm [resolvable:$true] %s61_s5 }
   0x9   :  { %28 = dma.hbm_to_vmem [thread:$0]  %s21_s22, 256, %s23_s26, [#allocation4], %s360_s23, %s360_s23, %s361_s24  }
   0xa   :  { %s363_s6 = smov [#allocation8]   ;;  %s364_s0 = smov [#allocation9]  }
   0xb   :  { %s52_s7 = sshll.u32 %s363_s6, 4  ;;  %s63_s8 = sshll.u32 %s364_s0, 4  ;;  %s53_s7 = int_to_ptr.vmem [resolvable:$true] %s52_s7  ;;  %s64_s8 = int_to_ptr.vmem [resolvable:$true] %s63_s8 }
   0xc   :  { %55 = dma.hbm_to_vmem [thread:$0]  %s51_s29, 128, %s53_s7, [#allocation7]  }
   0xd   :  { %66 = dma.hbm_to_vmem [thread:$0]  %s62_s5, 128, %s64_s8, [#allocation10]  }
   0xe   :  { %351 = dma.done.wait [#allocation4], 256  }
   0xf   :  { %352 = vsyncadd [#allocation4], 4294967040 }
  0x10   :  { %353 = dma.done.wait [#allocation7], 384  }
  0x11   :  { %354 = vsyncadd [#allocation7], 4294966912 }
  0x12   :  { %355 = dma.done.wait [#allocation10], 128  }
  0x13   :  { %356 = vsyncadd [#allocation10], 4294967168  ;;  %vm89_vm0 = vcmask 162816   ;;  %v365_v0 = vmov 0.0   ;;  %v118_v1 = vlaneseq  ;;  %v92_v3 = vld [vmem:[#allocation6] sm:$0xff]  ;;  %v93_v4 = vld [vmem:[#allocation6 + $0x8] sm:$0xff] }
  0x14   :  { %90 = vst.msk [vmem:[#allocation2] sm:$0xff] %vm89_vm0, %v365_v0  ;;  %v94_v5 = vld [vmem:[#allocation3] sm:$0xff]  ;;  %v95_v6 = vld [vmem:[#allocation3 + $0x8] sm:$0xff]  ;;  %s366_s2 = smov [#allocation11]   ;;  %s203_s12 = sshll.u32 %s423_s4, 4  ;;  %s204_s12 = int_to_ptr.hbm [resolvable:$true] %s203_s12 }
  0x15   :  { %91 = vst.msk [vmem:[#allocation2 + $0x8] sm:$0xff] %vm89_vm0, %v365_v0  ;;  %v406_v2 = vand.u32 127, %v118_v1  ;;  %v96_v7 = vsub.f32 %v92_v3, %v94_v5  ;;  %v97_v8 = vsub.f32 %v93_v4, %v95_v6  ;;  %v151_v9 = vld [vmem:[#allocation9] sm:$0xff]  ;;  %v170_v23 = vshrl.u32 %v118_v1, 7  ;;  %v150_v29 = vld [vmem:[#allocation8] sm:$0xff]  ;;  %s201_s3 = sshll.u32 %s366_s2, 4  ;;  %s202_s3 = int_to_ptr.vmem [resolvable:$true] %s201_s3 }
  0x16   :  { %v155_v12 = vand.u32 2147483647, %v151_v9  ;;  %v152_v33 = vmax.f32 %v151_v9, 0.0  ;;  %v153_v34 = vmul.f32 %v151_v9, %v150_v29 }
  0x17   :  { %vm122_vm1 = vcmp.lt.s32.totalorder %v406_v2, 16  ;;  %v98_v10 = vmul.f32 %v96_v7, %v96_v7  ;;  %v99_v13 = vmul.f32 %v97_v8, %v97_v8  ;;  %v173_v32 = vmul.u32 128, %v170_v23 }
  0x18   :  { %v156_v16 = vsub.f32 0.0, %v155_v12  ;;  %v154_v39 = vsub.f32 %v152_v33, %v153_v34  ;;  %vm186_vm4 = vcmp.eq.s32.totalorder %v170_v23, 0  ;;  %vm189_vm5 = vcmp.eq.s32.totalorder %v406_v2, 1 }
  0x19   :  { %v123_v15 = vsel %vm122_vm1, %v98_v10, 0.0  ;;  %v124_v17 = vsel %vm122_vm1, %v99_v13, 0.0  ;;  %v174_v37 = vadd.s32 %v173_v32, %v406_v2  ;;  %vm187_vm6 = vcmp.eq.s32.totalorder %v406_v2, 0  ;;  %vm190_vm7 = vmand %vm186_vm4, %vm189_vm5 }
  0x1a   :  { %v157_v20 = vmul.f32 1.442695, %v156_v16  ;;  %vm188_vm8 = vmand %vm186_vm4, %vm187_vm6 }
  0x1b   :  { %v125_v11 = vld [vmem:[#allocation2] sm:$0xff]  ;;  %vm175_vm3 = vcmp.lt.s32.totalorder %v174_v37, 16 }
  0x1c   :  { %v126_v14 = vld [vmem:[#allocation2 + $0x8] sm:$0xff]  ;;  %v127_v18 = vadd.f32 %v125_v11, %v123_v15  ;;  %227 = vpow2.f32 %v157_v20 }
  0x1d   :  { %v128_v19 = vadd.f32 %v126_v14, %v124_v17 }
  0x1e   :  { %130 = vst.msk [vmem:[#allocation2] sm:$0xff] %vm89_vm0, %v127_v18 }
  0x1f   :  { %131 = vst.msk [vmem:[#allocation2 + $0x8] sm:$0xff] %vm89_vm0, %v128_v19 }
  0x22   :  { %v228_v21 = vpop.eup %227 }
  0x23   :  { %v159_v26 = vadd.f32 1.0, %v228_v21  ;;  %v162_v27 = vmul.f32 -0.5, %v228_v21  ;;  %v165_v35 = vand.u32 2147483647, %v228_v21 }
  0x25   :  { %v135_v22 = vld [vmem:[#allocation2] sm:$0xff]  ;;  %229 = vlog2.f32 %v159_v26  ;;  %v163_v31 = vadd.f32 1.0, %v162_v27  ;;  %vm166_vm2 = vcmp.lt.f32.partialorder %v165_v35, 0.0004427343 }
  0x26   :  { %v136_v24 = vld [vmem:[#allocation2 + $0x8] sm:$0xff]  ;;  %v138_v25 = vsel %vm89_vm0, %v135_v22, 0.0 }
  0x27   :  { %v139_v28 = vsel %vm89_vm0, %v136_v24, 0.0  ;;  %v164_v36 = vmul.f32 %v228_v21, %v163_v31 }
  0x28   :  { %v140_v30 = vadd.f32 %v139_v28, %v138_v25 }
  0x2a   :  { %141 = vadd.xlane.f32.xlu0 %v140_v30 }
  0x2b   :  { %v230_v38 = vpop.eup %229 }
  0x2c   :  { %v161_v40 = vmul.f32 0.6931472, %v230_v38 }
  0x2e   :  { %v167_v41 = vsel %vm166_vm2, %v164_v36, %v161_v40 }
  0x2f   :  { %v168_v42 = vadd.f32 %v167_v41, %v154_v39 }
  0x31   :  { %v176_v43 = vsel %vm175_vm3, %v168_v42, 0.0 }
  0x32   :  { %177 = vadd.xlane.f32.xlu0 %v176_v43 }
  0x9d   :  { %v142_v44 = vpop.xlane.xlu0 %141 }
  0x9e   :  { %v143_v45 = vrot.slane %v142_v44, 4 }
  0xa0   :  { %v144_v46 = vadd.f32 %v143_v45, %v142_v44 }
  0xa2   :  { %v145_v47 = vrot.slane %v144_v46, 2 }
  0xa4   :  { %v146_v48 = vadd.f32 %v145_v47, %v144_v46 }
  0xa5   :  { %v178_v50 = vpop.xlane.xlu0 %177 }
  0xa6   :  { %v147_v49 = vrot.slane %v146_v48, 1  ;;  %v179_v52 = vrot.slane %v178_v50, 4 }
  0xa8   :  { %v148_v51 = vadd.f32 %v147_v49, %v146_v48  ;;  %v180_v53 = vadd.f32 %v179_v52, %v178_v50 }
  0xaa   :  { %215 = vpush %v148_v51  ;;  %v181_v54 = vrot.slane %v180_v53, 2 }
  0xac   :  { %v182_v55 = vadd.f32 %v181_v54, %v180_v53 }
  0xae   :  { %v183_v56 = vrot.slane %v182_v55, 1 }
  0xb0   :  { %v184_v57 = vadd.f32 %v183_v56, %v182_v55 }
  0xb2   :  { %217 = vpush %v184_v57 }
  0xdb   :  { %s216_s9 = spop %215 }
  0xdc   :  { %v193_v59 = vstv %s216_s9 }
  0xe3   :  { %s218_s13 = spop %217 }
  0xe4   :  { %v191_v58 = vstv %s218_s13 }
  0xe5   :  { %v192_v60 = vsel %vm190_vm7, %v191_v58, 0.0 }
  0xe6   :  { %v194_v61 = vsel %vm188_vm8, %v193_v59, %v192_v60 }
  0xe7   :  { %195 = vst [vmem:[#allocation11] sm:$0xff] %v194_v61 }
  0xe8   :  { %206 = dma.vmem_to_hbm [thread:$0]  %s202_s3, 128, %s204_s12, [#allocation5]  }
  0xe9   :  { %357 = dma.done.wait [#allocation5], 128  }
  0xea   :  { %358 = vsyncadd [#allocation5], 4294967168 }
  0xeb   :  { %211 = vsyncpa [#allocation4], 1 }
  0xec   :  { %212 = vsyncpa [#allocation7], 1 }
  0xed   :  { %213 = vsyncpa [#allocation10], 1 }
  0xee   :  { %214 = vsyncpa [#allocation5], 1 }

</bundles_post_ra>
